<compile_context>
chip_gen: v7x
topology: tpu7x:2x2x1
jax: 0.10.0
libtpu: 0.0.40
codegen_flags: <defaults>
</compile_context>

<pallas_src>
import functools

import jax
import jax.numpy as jnp
import numpy as np
from jax.experimental import pallas as pl
from jax.experimental.pallas import tpu as pltpu

TOKEN_BYTES = 31                 # UTF-8 bytes kept per token (exact below this)
PACKED_LEN = 8                   # 31 content bytes + 1 length byte = 8 int32 words
VOCAB_SIZE = 128                 # synthetic sentencepiece piece count
NUM_QUERY = 8                    # real tokens in the demo "line"
UNK_ID = 0                       # sp_model.unk_id() of the synthetic model
LANE = 128                       # V is padded to a lane multiple (host-side)
SUBLANE = 8                      # N is padded to a sublane multiple (host-side)

QUERY_PAD = -1                   # 0xFFFFFFFF: impossible for UTF-8-packed words
VOCAB_PAD = -2                   # 0xFFFFFFFE: impossible for UTF-8-packed words


# ------------------------------- device kernel ------------------------------

def _lookup_kernel(q_ref, v_ref, out_ref, *, vocab_size, unk_id):
    """Exact-match piece-id lookup.

    q_ref:   (N_pad, P)  int32  packed query tokens (queries on sublanes)
    v_ref:   (P, V_pad)  int32  packed piece table, lane-dense along V
    out_ref: (N_pad, 1)  int32  piece id per query (unk_id if OOV)
    """
    q = q_ref[...]                                    # (N_pad, P)
    vcb = v_ref[...]                                  # (P, V_pad)
    n_pad, p = q.shape
    v_pad = vcb.shape[1]

    # match[n, v] <=> all P packed words equal.  Each word compare is a single
    # (N_pad, V_pad) = (8, 128) vreg op on the VPU; exact by construction.
    match = None
    for c in range(p):                                # static unroll, P = 8
        eq = q[:, c:c + 1] == vcb[c:c + 1, :]         # (N_pad, V_pad) bool
        match = eq if match is None else jnp.logical_and(match, eq)

    # First matching vocab column per query: single lane-wise min.
    col = jax.lax.broadcasted_iota(jnp.int32, (n_pad, v_pad), 1)
    cand = jnp.where(match, col, jnp.int32(v_pad))
    first = jnp.min(cand, axis=1, keepdims=True)      # (N_pad, 1)

    # No match (or query padding) -> unk id.
    out_ref[...] = jnp.where(first >= vocab_size,
                             jnp.int32(unk_id), first).astype(jnp.int32)


def sp_piece_lookup(query_packed, vocab_packed, *,
                    vocab_size=VOCAB_SIZE, unk_id=UNK_ID):
    """query_packed: (N_pad, P) int32, vocab_packed: (P, V_pad) int32
    -> (N_pad, 1) int32 piece ids (caller slices off padded rows on host)."""
    n_pad = query_packed.shape[0]
    # Whole-array VMEM blocks, no grid: V=128 fits trivially.
    # TODO(synk): for realistic 32K+ piece vocabs (esp. v7x's 64 MiB VMEM),
    # add a grid axis over V marked "arbitrary" with a running-min (N_pad, 1)
    # accumulator in VMEM scratch (pl.when init/finalize).
    return pl.pallas_call(
        functools.partial(_lookup_kernel, vocab_size=vocab_size, unk_id=unk_id),
        out_shape=jax.ShapeDtypeStruct((n_pad, 1), jnp.int32),
        in_specs=[
            pl.BlockSpec(memory_space=pltpu.MemorySpace.VMEM),
            pl.BlockSpec(memory_space=pltpu.MemorySpace.VMEM),
        ],
        out_specs=pl.BlockSpec(memory_space=pltpu.MemorySpace.VMEM),
    )(query_packed, vocab_packed)


# ------------------------- host-side glue (strings) -------------------------

def encode_token(token: str) -> np.ndarray:
    """Pack a token into PACKED_LEN exact int32 words: 31 raw UTF-8 content
    bytes + 1 length byte, 4 bytes per word.  No lossy hashing, no f32.
    Exact for tokens up to 31 UTF-8 bytes (covers sentencepiece pieces)."""
    b = np.frombuffer(token.encode("utf-8"), dtype=np.uint8)
    raw = np.zeros(TOKEN_BYTES + 1, dtype=np.uint32)
    raw[:min(len(b), TOKEN_BYTES)] = b[:TOKEN_BYTES]
    raw[TOKEN_BYTES] = min(len(b), 255)              # length in spare byte
    words = ((raw[0::4] << 24) | (raw[1::4] << 16) |
             (raw[2::4] << 8) | raw[3::4])           # (PACKED_LEN,) uint32
    return words.astype(np.uint32).view(np.int32)


def pack_queries(tokens) -> np.ndarray:
    """Host-side packing + padding into the kernel-facing (N_pad, P) layout."""
    n = len(tokens)
    n_pad = -(-n // SUBLANE) * SUBLANE
    out = np.full((n_pad, PACKED_LEN), QUERY_PAD, dtype=np.int32)
    for i, t in enumerate(tokens):
        out[i] = encode_token(t)
    return out


def build_synthetic_sp_vocab():
    """Deterministic stand-in for sp_model.IdToPiece(i), i < GetPieceSize().
    Returns the piece list and the table prepacked in its final padded,
    transposed (P, V_pad) lane-dense-along-V layout (no device relayout)."""
    pieces = ["<unk>"] + [f"piece_{i}" for i in range(1, VOCAB_SIZE)]
    table = np.stack([encode_token(p) for p in pieces], axis=0)   # (V, P)
    v_pad = -(-len(pieces) // LANE) * LANE
    padded = np.full((v_pad, PACKED_LEN), VOCAB_PAD, dtype=np.int32)
    padded[:len(pieces)] = table
    return pieces, np.ascontiguousarray(padded.T)                 # (P, V_pad)


if __name__ == "__main__":
    pieces, vocab_packed_np = build_synthetic_sp_vocab()
    vocab_packed = jnp.asarray(vocab_packed_np)                   # (P, V_pad)

    # Deterministic "line": 6 in-vocab pieces + 2 out-of-vocab words.
    key = jax.random.PRNGKey(0)
    picks = np.asarray(jax.random.randint(key, (NUM_QUERY - 2,), 1, VOCAB_SIZE))
    query_tokens = [pieces[int(i)] for i in picks] + ["totally_oov", "???"]
    line = " ".join(query_tokens)

    # TODO(synk): sp_model.EncodeAsPieces' actual segmentation (unigram/BPE DP
    # over the raw string) has no Pallas equivalent; tokens are pre-segmented
    # on the host and only the exact piece lookup runs on TPU.
    tokens = line.split(" ")
    query_packed = jnp.asarray(pack_queries(tokens))              # (N_pad, P)

    ids_padded = jax.block_until_ready(
        sp_piece_lookup(query_packed, vocab_packed))
    ids = np.asarray(ids_padded)[:len(tokens), 0]

    # Map ids back to piece strings (EncodeAsPieces-style output).
    out_pieces = [pieces[int(i)] for i in ids]

    # Pure-Python reference: piece-table lookup with unk fallback.
    piece_to_id = {p: i for i, p in enumerate(pieces)}
    expected_ids = np.asarray([piece_to_id.get(t, UNK_ID) for t in tokens],
                              dtype=np.int32)
    expected_pieces = [pieces[int(i)] for i in expected_ids]

    np.testing.assert_array_equal(ids, expected_ids)
    assert out_pieces == expected_pieces
    print("KERNEL_OK")
</pallas_src>

<mosaic_0001>
module attributes {stable_mosaic.version = 11 : i64} {
  func.func @_lookup_kernel(%arg0: memref<8x8xi32, #tpu.memory_space<vmem>>, %arg1: memref<8x128xi32, #tpu.memory_space<vmem>>, %arg2: memref<8x1xi32, #tpu.memory_space<vmem>>) attributes {dimension_semantics = [], scalar_prefetch = 0 : i64, scratch_operands = 0 : i64, tpu.core_type = #tpu.core_type<tc>} {
    %c0 = arith.constant 0 : index
    %c0_0 = arith.constant 0 : index
    %0 = vector.load %arg0[%c0, %c0_0] : memref<8x8xi32, #tpu.memory_space<vmem>>, vector<8x8xi32>
    %c0_1 = arith.constant 0 : index
    %c0_2 = arith.constant 0 : index
    %1 = vector.load %arg1[%c0_1, %c0_2] : memref<8x128xi32, #tpu.memory_space<vmem>>, vector<8x128xi32>
    %2 = vector.extract_strided_slice %0 {offsets = [0, 0], sizes = [8, 1], strides = [1, 1]} : vector<8x8xi32> to vector<8x1xi32>
    %3 = vector.extract_strided_slice %1 {offsets = [0, 0], sizes = [1, 128], strides = [1, 1]} : vector<8x128xi32> to vector<1x128xi32>
    %4 = vector.broadcast %2 : vector<8x1xi32> to vector<8x128xi32>
    %5 = vector.broadcast %3 : vector<1x128xi32> to vector<8x128xi32>
    %6 = arith.cmpi eq, %4, %5 : vector<8x128xi32>
    %7 = vector.extract_strided_slice %0 {offsets = [0, 1], sizes = [8, 1], strides = [1, 1]} : vector<8x8xi32> to vector<8x1xi32>
    %8 = vector.extract_strided_slice %1 {offsets = [1, 0], sizes = [1, 128], strides = [1, 1]} : vector<8x128xi32> to vector<1x128xi32>
    %9 = vector.broadcast %7 : vector<8x1xi32> to vector<8x128xi32>
    %10 = vector.broadcast %8 : vector<1x128xi32> to vector<8x128xi32>
    %11 = arith.cmpi eq, %9, %10 : vector<8x128xi32>
    %12 = arith.andi %6, %11 : vector<8x128xi1>
    %13 = vector.extract_strided_slice %0 {offsets = [0, 2], sizes = [8, 1], strides = [1, 1]} : vector<8x8xi32> to vector<8x1xi32>
    %14 = vector.extract_strided_slice %1 {offsets = [2, 0], sizes = [1, 128], strides = [1, 1]} : vector<8x128xi32> to vector<1x128xi32>
    %15 = vector.broadcast %13 : vector<8x1xi32> to vector<8x128xi32>
    %16 = vector.broadcast %14 : vector<1x128xi32> to vector<8x128xi32>
    %17 = arith.cmpi eq, %15, %16 : vector<8x128xi32>
    %18 = arith.andi %12, %17 : vector<8x128xi1>
    %19 = vector.extract_strided_slice %0 {offsets = [0, 3], sizes = [8, 1], strides = [1, 1]} : vector<8x8xi32> to vector<8x1xi32>
    %20 = vector.extract_strided_slice %1 {offsets = [3, 0], sizes = [1, 128], strides = [1, 1]} : vector<8x128xi32> to vector<1x128xi32>
    %21 = vector.broadcast %19 : vector<8x1xi32> to vector<8x128xi32>
    %22 = vector.broadcast %20 : vector<1x128xi32> to vector<8x128xi32>
    %23 = arith.cmpi eq, %21, %22 : vector<8x128xi32>
    %24 = arith.andi %18, %23 : vector<8x128xi1>
    %25 = vector.extract_strided_slice %0 {offsets = [0, 4], sizes = [8, 1], strides = [1, 1]} : vector<8x8xi32> to vector<8x1xi32>
    %26 = vector.extract_strided_slice %1 {offsets = [4, 0], sizes = [1, 128], strides = [1, 1]} : vector<8x128xi32> to vector<1x128xi32>
    %27 = vector.broadcast %25 : vector<8x1xi32> to vector<8x128xi32>
    %28 = vector.broadcast %26 : vector<1x128xi32> to vector<8x128xi32>
    %29 = arith.cmpi eq, %27, %28 : vector<8x128xi32>
    %30 = arith.andi %24, %29 : vector<8x128xi1>
    %31 = vector.extract_strided_slice %0 {offsets = [0, 5], sizes = [8, 1], strides = [1, 1]} : vector<8x8xi32> to vector<8x1xi32>
    %32 = vector.extract_strided_slice %1 {offsets = [5, 0], sizes = [1, 128], strides = [1, 1]} : vector<8x128xi32> to vector<1x128xi32>
    %33 = vector.broadcast %31 : vector<8x1xi32> to vector<8x128xi32>
    %34 = vector.broadcast %32 : vector<1x128xi32> to vector<8x128xi32>
    %35 = arith.cmpi eq, %33, %34 : vector<8x128xi32>
    %36 = arith.andi %30, %35 : vector<8x128xi1>
    %37 = vector.extract_strided_slice %0 {offsets = [0, 6], sizes = [8, 1], strides = [1, 1]} : vector<8x8xi32> to vector<8x1xi32>
    %38 = vector.extract_strided_slice %1 {offsets = [6, 0], sizes = [1, 128], strides = [1, 1]} : vector<8x128xi32> to vector<1x128xi32>
    %39 = vector.broadcast %37 : vector<8x1xi32> to vector<8x128xi32>
    %40 = vector.broadcast %38 : vector<1x128xi32> to vector<8x128xi32>
    %41 = arith.cmpi eq, %39, %40 : vector<8x128xi32>
    %42 = arith.andi %36, %41 : vector<8x128xi1>
    %43 = vector.extract_strided_slice %0 {offsets = [0, 7], sizes = [8, 1], strides = [1, 1]} : vector<8x8xi32> to vector<8x1xi32>
    %44 = vector.extract_strided_slice %1 {offsets = [7, 0], sizes = [1, 128], strides = [1, 1]} : vector<8x128xi32> to vector<1x128xi32>
    %45 = vector.broadcast %43 : vector<8x1xi32> to vector<8x128xi32>
    %46 = vector.broadcast %44 : vector<1x128xi32> to vector<8x128xi32>
    %47 = arith.cmpi eq, %45, %46 : vector<8x128xi32>
    %48 = arith.andi %42, %47 : vector<8x128xi1>
    %49 = tpu.iota {dimensions = array<i32: 1>} : vector<8x128xi32>
    %c128_i32 = arith.constant 128 : i32
    %50 = vector.broadcast %c128_i32 : i32 to vector<8x128xi32>
    %51 = arith.select %48, %49, %50 : vector<8x128xi1>, vector<8x128xi32>
    %cst = arith.constant dense<2147483647> : vector<8xi32>
    %52 = vector.multi_reduction <minsi>, %51, %cst [1] : vector<8x128xi32> to vector<8xi32>
    %53 = vector.shape_cast %52 : vector<8xi32> to vector<8x1xi32>
    %c128_i32_3 = arith.constant 128 : i32
    %54 = vector.broadcast %c128_i32_3 : i32 to vector<8x1xi32>
    %55 = arith.cmpi sge, %53, %54 : vector<8x1xi32>
    %c0_i32 = arith.constant 0 : i32
    %56 = vector.broadcast %c0_i32 : i32 to vector<8x1xi32>
    %57 = arith.select %55, %56, %53 : vector<8x1xi1>, vector<8x1xi32>
    %c0_4 = arith.constant 0 : index
    %c0_5 = arith.constant 0 : index
    %58 = vector.load %arg2[%c0_4, %c0_5] : memref<8x1xi32, #tpu.memory_space<vmem>>, vector<8x1xi32>
    tpu.vector_store %arg2[%c0_4, %c0_5], %57 {strides = array<i32>} : memref<8x1xi32, #tpu.memory_space<vmem>>, vector<8x1xi32>,
    return
  }
}

</mosaic_0001>

<bundles_post_ra>
// kernel: tpu_custom_call.1
= control target key start
LH: loop header
LB: loop body
LE: loop exit
PB: predicated region body
PF: predicated region fallthrough
CT: control target
= control target key end

     0   :  { %7 = vsyncpa [#allocation3], 0  ;;  %s254_s0 = inlined_call_operand.hbm [shape: s32[8,8], index: 0, kind: input, shape index: {}]   ;;  %s255_s1 = inlined_call_operand.hbm [shape: s32[8,128], index: 1, kind: input, shape index: {}]   ;;  %s256_s2 = inlined_call_operand.vmem [shape: s32[8,1], index: 2, kind: output, shape index: {}]  }
   0x1   :  { %8 = vsyncpa [#allocation5], 0  ;;  %s202_s9 = smov [#allocation2]   ;;  %s203_s11 = smov [#allocation4]  }
   0x2   :  { %s15_s10 = sshll.u32 %s202_s9, 4  ;;  %s25_s12 = sshll.u32 %s203_s11, 4  ;;  %s16_s10 = int_to_ptr.vmem [resolvable:$true] %s15_s10  ;;  %s26_s12 = int_to_ptr.vmem [resolvable:$true] %s25_s12 }
   0x3   :  { %s154_s15 = scalar_lea.hbm %s254_s0, 128 }
   0x4   :  { %p155_p0 = scmp.ne.s32.totalorder %s254_s0, %s154_s15  ;;  %p158_p1 = scmp.lt.u32.totalorder %s154_s15, %s254_s0 }
   0x6   :  { %p160_p2 = pnand %p158_p1, %p155_p0 }
   0x8   :  { %163 = shalt.err (!%p160_p2)
}
   0x9   :  { %s164_s20 = scalar_lea.vmem %s16_s10, 128  ;;  %p169_p4 = scmp.lt.s32.totalorder %s16_s10, %s16_s10 }
   0xa   :  { %p165_p3 = scmp.ne.s32.totalorder %s16_s10, %s164_s20  ;;  %p170_p5 = scmp.lt.s32.totalorder %s164_s20, %s164_s20 }
   0xc   :  { %p171_p6 = por %p170_p5, %p169_p4 }
   0xe   :  { %p172_p7 = pnand %p171_p6, %p165_p3 }
  0x10   :  { %175 = shalt.err (!%p172_p7)
}
  0x11   :  { %18 = dma.hbm_to_vmem [thread:$0]  %s254_s0, 128, %s16_s10, [#allocation3]  }
  0x12   :  { %s176_s25 = scalar_lea.hbm %s255_s1, 128 }
  0x13   :  { %p177_p8 = scmp.ne.s32.totalorder %s255_s1, %s176_s25  ;;  %p180_p9 = scmp.lt.u32.totalorder %s176_s25, %s255_s1 }
  0x15   :  { %p182_p10 = pnand %p180_p9, %p177_p8 }
  0x17   :  { %185 = shalt.err (!%p182_p10)
}
  0x18   :  { %s186_s30 = scalar_lea.vmem %s26_s12, 128  ;;  %p191_p12 = scmp.lt.s32.totalorder %s26_s12, %s26_s12 }
  0x19   :  { %p187_p11 = scmp.ne.s32.totalorder %s26_s12, %s186_s30  ;;  %p192_p13 = scmp.lt.s32.totalorder %s186_s30, %s186_s30 }
  0x1b   :  { %p193_p0 = por %p192_p13, %p191_p12 }
  0x1d   :  { %p194_p1 = pnand %p193_p0, %p187_p11 }
  0x1f   :  { %197 = shalt.err (!%p194_p1)
}
  0x20   :  { %28 = dma.hbm_to_vmem [thread:$0]  %s255_s1, 128, %s26_s12, [#allocation5]  }
  0x21   :  { %198 = dma.done.wait [#allocation3], 128  }
  0x22   :  { %199 = vsyncadd [#allocation3], 4294967168 }
  0x23   :  { %200 = dma.done.wait [#allocation5], 128  }
  0x24   :  { %201 = vsyncadd [#allocation5], 4294967168  ;;  %v204_v0 = vmov 2   ;;  %v205_v1 = vmov 0   ;;  %v35_v2 = vld [vmem:[#allocation2] sm:$0xff]  ;;  %v206_v3 = vmov 3   ;;  %v40_v9 = vlaneseq }
  0x25   :  { %147 = vset.pattern.permute.xlu1 %v204_v0  ;;  %145 = vset.pattern.permute.xlu0 %v205_v1  ;;  %v207_v4 = vmov 1   ;;  %v208_v5 = vmov 4   ;;  %v209_v6 = vmov 5   ;;  %v210_v7 = vmov 6   ;;  %v36_v15 = vld [vmem:[#allocation4] sm:$0xff] }
  0x26   :  { %55 = vperm.xlu1 %147, %v35_v2   ;;  %38 = vperm.xlu0 %145, %v35_v2   ;;  %v211_v8 = vmov 7   ;;  %v41_v10 = vshrl.u32 %v40_v9, 7  ;;  %v109_v35 = vand.u32 127, %v40_v9 }
  0x28   :  { %v42_v11 = vsub.s32 0, %v41_v10  ;;  %v50_v12 = vsub.s32 1, %v41_v10  ;;  %v59_v18 = vsub.s32 2, %v41_v10  ;;  %v77_v21 = vsub.s32 4, %v41_v10 }
  0x29   :  { %v68_v22 = vsub.s32 3, %v41_v10  ;;  %v86_v24 = vsub.s32 5, %v41_v10  ;;  %v95_v27 = vsub.s32 6, %v41_v10  ;;  %v104_v30 = vsub.s32 7, %v41_v10 }
  0x2a   :  { %148 = vset.pattern.permute.xlu1 %v206_v3  ;;  %146 = vset.pattern.permute.xlu0 %v207_v4  ;;  %v43_v16 = vrot.slane %v36_v15, %v42_v11  ;;  %v51_v17 = vrot.slane %v36_v15, %v50_v12  ;;  %v60_v23 = vrot.slane %v36_v15, %v59_v18 }
  0x2b   :  { %64 = vperm.xlu1 %148, %v35_v2   ;;  %46 = vperm.xlu0 %146, %v35_v2   ;;  %v78_v25 = vrot.slane %v36_v15, %v77_v21  ;;  %v69_v28 = vrot.slane %v36_v15, %v68_v22  ;;  %v87_v29 = vrot.slane %v36_v15, %v86_v24 }
  0x2c   :  { %v96_v32 = vrot.slane %v36_v15, %v95_v27  ;;  %v105_v34 = vrot.slane %v36_v15, %v104_v30 }
  0x2f   :  { %149 = vset.pattern.permute.xlu1 %v208_v5  ;;  %150 = vset.pattern.permute.xlu0 %v209_v6 }
  0x30   :  { %73 = vperm.xlu1 %149, %v35_v2   ;;  %82 = vperm.xlu0 %150, %v35_v2  }
  0x34   :  { %151 = vset.pattern.permute.xlu1 %v210_v7  ;;  %153 = vset.pattern.permute.xlu0 %v211_v8 }
  0x35   :  { %91 = vperm.xlu1 %151, %v35_v2  }
  0x39   :  { %152 = vset.pattern.permute.xlu1 %v211_v8 }
  0x3a   :  { %100 = vperm.xlu1 %152, %v35_v2  }
  0xa5   :  { %v56_v13 = vpop.permute.xlu1 %55  ;;  %v39_v14 = vpop.permute.xlu0 %38 }
  0xa6   :  { %vm44_vm0 = vcmp.eq.s32.totalorder %v39_v14, %v43_v16  ;;  %vm61_vm3 = vcmp.eq.s32.totalorder %v56_v13, %v60_v23 }
  0xaa   :  { %v65_v19 = vpop.permute.xlu1 %64  ;;  %v47_v20 = vpop.permute.xlu0 %46 }
  0xab   :  { %vm52_vm1 = vcmp.eq.s32.totalorder %v47_v20, %v51_v17  ;;  %vm70_vm6 = vcmp.eq.s32.totalorder %v65_v19, %v69_v28 }
  0xac   :  { %vm53_vm2 = vmand %vm44_vm0, %vm52_vm1  ;;  %vm127_vm0 = vcmask 7168  }
  0xad   :  { %vm62_vm4 = vmand %vm53_vm2, %vm61_vm3 }
  0xae   :  { %vm71_vm7 = vmand %vm62_vm4, %vm70_vm6 }
  0xaf   :  { %v74_v26 = vpop.permute.xlu1 %73  ;;  %v83_v31 = vpop.permute.xlu0 %82 }
  0xb0   :  { %vm79_vm5 = vcmp.eq.s32.totalorder %v74_v26, %v78_v25  ;;  %vm88_vm9 = vcmp.eq.s32.totalorder %v83_v31, %v87_v29 }
  0xb1   :  { %vm80_vm8 = vmand %vm71_vm7, %vm79_vm5 }
  0xb2   :  { %vm89_vm11 = vmand %vm80_vm8, %vm88_vm9 }
  0xb4   :  { %v92_v33 = vpop.permute.xlu1 %91 }
  0xb5   :  { %vm97_vm10 = vcmp.eq.s32.totalorder %v92_v33, %v96_v32 }
  0xb6   :  { %vm98_vm12 = vmand %vm89_vm11, %vm97_vm10 }
  0xb9   :  { %v101_v36 = vpop.permute.xlu1 %100 }
  0xba   :  { %vm106_vm13 = vcmp.eq.s32.totalorder %v101_v36, %v105_v34 }
  0xbb   :  { %vm107_vm14 = vmand %vm98_vm12, %vm106_vm13 }
  0xbc   :  { %v110_v37 = vsel %vm107_vm14, %v109_v35, 128 }
  0xbd   :  { %v112_v38 = vshra.s32 %v110_v37, 16  ;;  %v111_v40 = vand.u32 65535, %v110_v37 }
  0xbf   :  { %v114_v39 = vcvt.s32.f32 %v112_v38  ;;  %v113_v42 = vcvt.s32.f32 %v111_v40 }
  0xc1   :  { %115 = vmin.xlane.f32.xlu0 %v114_v39 }
 0x14e   :  { %v116_v41 = vpop.xlane.xlu0 %115 }
 0x14f   :  { %vm117_vm15 = vcmp.eq.f32.partialorder %v114_v39, %v116_v41  ;;  %v122_v44 = vcvt.f32.s32 %v116_v41 }
 0x150   :  { %v118_v43 = vsel %vm117_vm15, %v113_v42, inf }
 0x151   :  { %119 = vmin.xlane.f32.xlu1 %v118_v43  ;;  %v123_v46 = vshll.u32 %v122_v44, 16 }
 0x1de   :  { %v120_v45 = vpop.xlane.xlu1 %119 }
 0x1df   :  { %v121_v47 = vcvt.f32.s32 %v120_v45 }
 0x1e1   :  { %v124_v48 = vadd.s32 %v123_v46, %v121_v47 }
 0x1e3   :  { %vm125_vm1 = vcmp.ge.s32.totalorder %v124_v48, 128 }
 0x1e4   :  { %v126_v49 = vsel %vm125_vm1, 0, %v124_v48 }
 0x1e5   :  { %128 = vst.msk [vmem:[%s256_s2] sm:$0xff] %vm127_vm0, %v126_v49 }
 0x1e6   :  { %133 = vsyncpa [#allocation3], 1 }
 0x1e7   :  { %134 = vsyncpa [#allocation5], 1 }

</bundles_post_ra>
